<compile_context>
chip_gen: v7x
topology: tpu7x:2x2x1
jax: 0.10.0
libtpu: 0.0.40
codegen_flags: <defaults>
</compile_context>

<pallas_src>
import jax
import jax.numpy as jnp
from jax.experimental import pallas as pl
from jax.experimental.pallas import tpu as pltpu


def _round_up(n, m):
    return ((n + m - 1) // m) * m


def _bilinear_sym_kernel(x_ref, wt_ref, dflat_ref, bias_ref, out_ref):
    # x_ref:     (2, bm, D)    bf16  -- x0 / x1 stacked along the leading axis
    # wt_ref:    (D, R*Cp)     bf16  -- W^T, r-major columns (col = r*Cp + c)
    # dflat_ref: (1, R*Cp)     f32   -- diag in the same r-major column order
    # bias_ref:  (1, Cp)       f32
    # out_ref:   (bm, Cp)      f32
    two, bm, d = x_ref.shape
    rcp = wt_ref.shape[1]
    cp = out_ref.shape[1]
    r_groups = rcp // cp                       # static Python int (= rang)

    # Single fused MXU contraction over D for both halves (bf16 in, f32 accumulate).
    x01 = x_ref[...].reshape(two * bm, d)                                  # (2*bm, D)
    y = jnp.dot(x01, wt_ref[...], preferred_element_type=jnp.float32)     # (2*bm, R*Cp)

    # diag folded elementwise on the x0 half, then the bilinear product (all f32 VPU).
    prod = (y[:bm, :] * dflat_ref[...]) * y[bm:, :]                        # (bm, R*Cp)

    # R-group reduction: static lane-aligned slices + plain VPU adds
    # (replaces the old dense 0/1 grouping matmul).
    acc = prod[:, 0:cp]
    for r in range(1, r_groups):
        acc = acc + prod[:, r * cp:(r + 1) * cp]

    out_ref[...] = acc + bias_ref[...]         # bias broadcast over the batch rows


def _vmem_limit_bytes(block_b, d, rcp, c_pad):
    bf16, f32 = 2, 4
    est = (
        2 * (2 * block_b * d * bf16)            # x tile (double-buffered)
        + 2 * (d * rcp * bf16)                  # W^T (invariant; counted 2x to be safe)
        + 2 * (rcp * f32) + 2 * (c_pad * f32)   # diag row + bias row
        + 2 * (block_b * c_pad * f32)           # output tile (double-buffered)
        + (3 * block_b * rcp + 2 * block_b * c_pad) * f32   # y / prod / acc temporaries
    )
    # Raise above the 32 MiB scoped default only when needed; stay under v7x's 64 MiB.
    return min(64 * 1024 * 1024, max(32 * 1024 * 1024, int(est * 1.25)))


def classif_bil_sym(x, weight, diag, bias, *, block_b=None):
    """Pallas forward of torchmodule_Classif_Bil_Sym.

    x:      (B, dim, 2) float32
    weight: (C, R, dim) float32
    diag:   (C, R)      float32
    bias:   (C,)        float32
    returns (B, C)      float32
    """
    B, D, two = x.shape
    assert two == 2, "last axis of X must hold the pair of vectors"
    C, R, D2 = weight.shape
    assert D2 == D

    # Lane-dense class padding; r-major column layout => total width R * C_pad.
    C_pad = _round_up(C, 128)
    RCp = R * C_pad

    # Batch tile (MXU M-dim): multiple of 8 sublanes, and >= 2 grid steps by default
    # so v7x's two TensorCores both get work and the DMA pipeline overlaps compute.
    if block_b is None:
        block_b = min(512, max(8, _round_up((B + 1) // 2, 8)))
    block_b = max(8, _round_up(block_b, 8))
    B_pad = _round_up(B, block_b)

    # Activation laid out once as (2, B_pad, D); MXU inputs in bf16.
    x2 = jnp.transpose(x, (2, 0, 1))
    if B_pad != B:
        x2 = jnp.pad(x2, ((0, 0), (0, B_pad - B), (0, 0)))
    x2 = x2.astype(jnp.bfloat16)

    # W^T with r-major columns: col r*C_pad + c holds weight[c, r, :].
    w_r = jnp.transpose(weight, (1, 0, 2))                        # (R, C, D)
    w_r = jnp.pad(w_r, ((0, 0), (0, C_pad - C), (0, 0)))          # (R, C_pad, D)
    wt = jnp.transpose(w_r.reshape(RCp, D)).astype(jnp.bfloat16)  # (D, R*C_pad)

    # diag in the same r-major order (kept f32; elementwise math stays f32).
    dflat = jnp.pad(diag.astype(jnp.float32).T,
                    ((0, 0), (0, C_pad - C))).reshape(1, RCp)     # (1, R*C_pad)

    bias2d = jnp.pad(bias.astype(jnp.float32).reshape(1, C),
                     ((0, 0), (0, C_pad - C)))                    # (1, C_pad)

    grid = (B_pad // block_b,)

    out = pl.pallas_call(
        _bilinear_sym_kernel,
        out_shape=jax.ShapeDtypeStruct((B_pad, C_pad), jnp.float32),
        grid_spec=pltpu.PrefetchScalarGridSpec(
            num_scalar_prefetch=0,
            grid=grid,
            in_specs=[
                pl.BlockSpec((2, block_b, D), lambda i: (0, i, 0)),  # stacked x0/x1 tile
                pl.BlockSpec((D, RCp), lambda i: (0, 0)),            # W^T (grid-invariant)
                pl.BlockSpec((1, RCp), lambda i: (0, 0)),            # diag row
                pl.BlockSpec((1, C_pad), lambda i: (0, 0)),          # bias row
            ],
            out_specs=pl.BlockSpec((block_b, C_pad), lambda i: (i, 0)),
        ),
        compiler_params=pltpu.CompilerParams(
            dimension_semantics=("parallel",),
            vmem_limit_bytes=_vmem_limit_bytes(block_b, D, RCp, C_pad),
            # Allow XLA to fuse the wrapper-side transpose/pad/cast producers into the
            # pallas call instead of materializing them as extra HBM round trips.
            allow_input_fusion=[True, True, True, True],
        ),
    )(x2, wt, dflat, bias2d)

    # Strip batch / class padding.
    return out[:B, :C]


def classif_bil_sym_ref(x, weight, diag, bias):
    """Pure-JAX reference matching the PyTorch forward exactly (f32)."""
    Y = jnp.einsum('crd,bde->bcre', weight, x,
                   precision=jax.lax.Precision.HIGHEST)   # (B, C, R, 2)
    Y0 = Y[..., 0] * diag[None]                           # (B, C, R)
    Y1 = Y[..., 1]                                        # (B, C, R)
    return (Y0 * Y1).sum(axis=-1) + bias[None]            # (B, C)


def _make_inputs(key, B, D, C, R):
    kx, kw, kd, kb = jax.random.split(key, 4)
    x = jax.random.normal(kx, (B, D, 2), dtype=jnp.float32)
    # Deterministic init mimicking the PyTorch __init__ (xavier_normal_ / normal_).
    std_w = (2.0 / ((R + C) * D)) ** 0.5
    std_d = (2.0 / (C + R)) ** 0.5
    weight = std_w * jax.random.normal(kw, (C, R, D), dtype=jnp.float32)
    diag = std_d * jax.random.normal(kd, (C, R), dtype=jnp.float32)
    bias = jax.random.normal(kb, (C,), dtype=jnp.float32)
    return x, weight, diag, bias


def _check(x, weight, diag, bias, **kw):
    out = jax.block_until_ready(classif_bil_sym(x, weight, diag, bias, **kw))
    ref_f32 = classif_bil_sym_ref(x, weight, diag, bias)
    # Same-rounding reference: bf16 MXU operands, f32 accumulate (tight check).
    ref_b16 = classif_bil_sym_ref(
        x.astype(jnp.bfloat16).astype(jnp.float32),
        weight.astype(jnp.bfloat16).astype(jnp.float32), diag, bias)
    assert out.shape == ref_f32.shape, (out.shape, ref_f32.shape)
    assert jnp.allclose(out, ref_b16, atol=2e-3, rtol=2e-3), (out, ref_b16)
    assert jnp.allclose(out, ref_f32, atol=5e-2, rtol=5e-2), (out, ref_f32)


if __name__ == "__main__":
    key = jax.random.PRNGKey(0)
    k1, k2 = jax.random.split(key)

    # Ragged batch (padding + multi-step grid), non-multiple-of-128 classes, rang=2.
    x, w, d, b = _make_inputs(k1, B=50, D=32, C=10, R=2)
    _check(x, w, d, b)                 # default block_b -> 2 grid steps
    _check(x, w, d, b, block_b=16)     # explicit small tile -> 4 grid steps

    # Different dim / rank to exercise the unrolled R-group adds.
    x, w, d, b = _make_inputs(k2, B=17, D=16, C=3, R=4)
    _check(x, w, d, b)

    print("KERNEL_OK")
</pallas_src>

<mosaic_0001>
module attributes {stable_mosaic.version = 11 : i64} {
  func.func @_bilinear_sym_kernel(%arg0: i32, %arg1: memref<2x32x32xbf16, #tpu.memory_space<vmem>>, %arg2: memref<32x256xbf16, #tpu.memory_space<vmem>>, %arg3: memref<1x256xf32, #tpu.memory_space<vmem>>, %arg4: memref<1x128xf32, #tpu.memory_space<vmem>>, %arg5: memref<32x128xf32, #tpu.memory_space<vmem>>) attributes {dimension_semantics = [#tpu.dimension_semantics<parallel>], iteration_bounds = array<i64: 2>, scalar_prefetch = 0 : i64, scratch_operands = 0 : i64, tpu.core_type = #tpu.core_type<tc>, window_params = [{transform_indices = @transform_0, window_bounds = array<i64: 2, 32, 32>}, {pipeline_mode = #tpu.pipeline_mode<synchronous>, transform_indices = @transform_1, window_bounds = array<i64: 32, 256>}, {pipeline_mode = #tpu.pipeline_mode<synchronous>, transform_indices = @transform_2, window_bounds = array<i64: 1, 256>}, {pipeline_mode = #tpu.pipeline_mode<synchronous>, transform_indices = @transform_3, window_bounds = array<i64: 1, 128>}, {transform_indices = @transform_4, window_bounds = array<i64: 32, 128>}]} {
    %c0 = arith.constant 0 : index
    %c0_0 = arith.constant 0 : index
    %c0_1 = arith.constant 0 : index
    %0 = vector.load %arg1[%c0, %c0_0, %c0_1] : memref<2x32x32xbf16, #tpu.memory_space<vmem>>, vector<2x32x32xbf16>
    %1 = vector.shape_cast %0 : vector<2x32x32xbf16> to vector<64x32xbf16>
    %c0_2 = arith.constant 0 : index
    %c0_3 = arith.constant 0 : index
    %2 = vector.load %arg2[%c0_2, %c0_3] : memref<32x256xbf16, #tpu.memory_space<vmem>>, vector<32x256xbf16>
    %cst = arith.constant dense<0.000000e+00> : vector<64x256xf32>
    %3 = tpu.matmul %1, %2, %cst {dimension_numbers = #tpu.dot_dimension_numbers<[1], [0], [0], [1], [0, 0, 1, 1], [], []>} : vector<64x32xbf16>, vector<32x256xbf16>, vector<64x256xf32> -> vector<64x256xf32>
    %4 = vector.extract_strided_slice %3 {offsets = [0, 0], sizes = [32, 256], strides = [1, 1]} : vector<64x256xf32> to vector<32x256xf32>
    %c0_4 = arith.constant 0 : index
    %c0_5 = arith.constant 0 : index
    %5 = vector.load %arg3[%c0_4, %c0_5] : memref<1x256xf32, #tpu.memory_space<vmem>>, vector<1x256xf32>
    %6 = vector.broadcast %5 : vector<1x256xf32> to vector<32x256xf32>
    %7 = arith.mulf %4, %6 : vector<32x256xf32>
    %8 = vector.extract_strided_slice %3 {offsets = [32, 0], sizes = [32, 256], strides = [1, 1]} : vector<64x256xf32> to vector<32x256xf32>
    %9 = arith.mulf %7, %8 : vector<32x256xf32>
    %10 = vector.extract_strided_slice %9 {offsets = [0, 0], sizes = [32, 128], strides = [1, 1]} : vector<32x256xf32> to vector<32x128xf32>
    %11 = vector.extract_strided_slice %9 {offsets = [0, 128], sizes = [32, 128], strides = [1, 1]} : vector<32x256xf32> to vector<32x128xf32>
    %12 = arith.addf %10, %11 : vector<32x128xf32>
    %c0_6 = arith.constant 0 : index
    %c0_7 = arith.constant 0 : index
    %13 = vector.load %arg4[%c0_6, %c0_7] : memref<1x128xf32, #tpu.memory_space<vmem>>, vector<1x128xf32>
    %14 = vector.broadcast %13 : vector<1x128xf32> to vector<32x128xf32>
    %15 = arith.addf %12, %14 : vector<32x128xf32>
    %c0_8 = arith.constant 0 : index
    %c0_9 = arith.constant 0 : index
    %16 = vector.load %arg5[%c0_8, %c0_9] : memref<32x128xf32, #tpu.memory_space<vmem>>, vector<32x128xf32>
    tpu.vector_store %arg5[%c0_8, %c0_9], %15 {strides = array<i32>} : memref<32x128xf32, #tpu.memory_space<vmem>>, vector<32x128xf32>,
    return
  }
  func.func @transform_0(%arg0: i32) -> (i32, i32, i32) {
    %c0_i32 = arith.constant 0 : i32
    %c0_i32_0 = arith.constant 0 : i32
    %c0_i32_1 = arith.constant 0 : i32
    return %c0_i32, %arg0, %c0_i32_0 : i32, i32, i32
  }
  func.func @transform_1(%arg0: i32) -> (i32, i32) {
    %c0_i32 = arith.constant 0 : i32
    %c0_i32_0 = arith.constant 0 : i32
    %c0_i32_1 = arith.constant 0 : i32
    return %c0_i32, %c0_i32_0 : i32, i32
  }
  func.func @transform_2(%arg0: i32) -> (i32, i32) {
    %c0_i32 = arith.constant 0 : i32
    %c0_i32_0 = arith.constant 0 : i32
    %c0_i32_1 = arith.constant 0 : i32
    return %c0_i32, %c0_i32_0 : i32, i32
  }
  func.func @transform_3(%arg0: i32) -> (i32, i32) {
    %c0_i32 = arith.constant 0 : i32
    %c0_i32_0 = arith.constant 0 : i32
    %c0_i32_1 = arith.constant 0 : i32
    return %c0_i32, %c0_i32_0 : i32, i32
  }
  func.func @transform_4(%arg0: i32) -> (i32, i32) {
    %c0_i32 = arith.constant 0 : i32
    %c0_i32_0 = arith.constant 0 : i32
    return %arg0, %c0_i32 : i32, i32
  }
}

</mosaic_0001>

<bundles_post_ra>
// kernel: tpu_custom_call.1
= control target key start
LH: loop header
LB: loop body
LE: loop exit
PB: predicated region body
PF: predicated region fallthrough
CT: control target
= control target key end

     0   :  { %9 = vsyncpa [#allocation4], 0  ;;  %s848_s0 = inlined_call_operand.vmem [shape: bf16[2,64,32], index: 0, kind: input, shape index: {}]   ;;  %s849_s1 = inlined_call_operand.vmem [shape: bf16[32,256], index: 1, kind: input, shape index: {}]   ;;  %s850_s2 = inlined_call_operand.vmem [shape: f32[1,256], index: 2, kind: input, shape index: {}]   ;;  %s851_s3 = inlined_call_operand.vmem [shape: f32[1,128], index: 3, kind: input, shape index: {}]   ;;  %s852_s4 = inlined_call_operand.hbm [shape: f32[64,128], index: 4, kind: output, shape index: {}]  }
   0x1   :  { %11 = vsyncpa [#allocation4 + $0x1], 0  ;;  %s714_s15 = smov 0   ;;  %s716_s16 = smov 0  }
   0x2   :  { %s718_s17 = smov 0   ;;  %s720_s18 = smov 0  }
   0x3 LB: > { %s535_s19 = sadd.s32 4294967295, %s683_s18   ;;  %s536_s20 = sadd.s32 4294967294, %s683_s18   ;;  %s683_s18 = sphi %s720_s18, %s858_s18   ;;  %s679_s17 = sphi %s718_s17, %s857_s17   ;;  %s675_s16 = sphi %s716_s16, %s856_s16   ;;  %s671_s15 = sphi %s714_s15, %s855_s15  }
   0x4   : > { %s737_s21 = sadd.s32 1, %s683_s18   ;;  %s24_s22 = sadd.s32 1, %s679_s17 }
   0x5   : > { %s21_s23 = ssub.s32 %s683_s18, %s737_s21  ;;  %p31_p0 = scmp.ne.s32.totalorder %s679_s17, %s675_s16 }
   0x6   : > { %p22_p1 = scmp.eq.s32.totalorder %s21_s23, 0  ;;  %p32_p2 = scmp.eq.s32.totalorder %s683_s18, 0 }
   0x7   : > { %p124_p3 = scmp.eq.s32.totalorder %s535_s19, 1  ;;  %p129_p4 = scmp.ne.s32.totalorder %s675_s16, %s671_s15 }
   0x8   : > { %s750_s24 = scalar_select %p22_p1, %s679_s17, %s24_s22  }
   0x9   : > { %p33_p5 = por %p32_p2, %p31_p0  ;;  %p752_p6 = por %p124_p3, %p31_p0 }
   0xa   : > { %p130_p7 = scmp.eq.s32.totalorder %s536_s20, 1  ;;  %p538_p9 = scmp.ge.s32.totalorder %s683_s18, 2 }
   0xc   : > { %p756_p8 = por %p130_p7, %p129_p4  ;;  %155 = sbr.rel (%p538_p9) target bundleno = 26 (0x1a), region = 28 }
  0x13   : > { %158 = sbr.rel (!%p33_p5) target bundleno = 26 (0x1a), region = 32  ;;  %s160_s27 = sand.u32 (%p33_p5), 1, %s679_s17  }
  0x14   : > { %s563_s28 = sshll.u32 (%p33_p5), %s683_s18, 4  ;;  %s539_s29 = sshll.u32 (%p33_p5), %s160_s27, 5 }
  0x15   : > { %s165_s6 = scalar_lea.vmem (%p33_p5), %s848_s0, %s563_s28  ;;  %s162_s7 = scalar_lea.vmem (%p33_p5), [#allocation2], %s539_s29 }
  0x16   : > { %v181_v0 = vld [vmem:[%s165_s6] sm:$0xff] (%p33_p5)   ;;  %v185_v1 = vld [vmem:[%s165_s6 + $0x8] sm:$0xff] (%p33_p5)  }
  0x17   : > { %v189_v2 = vld [vmem:[%s165_s6 + $0x20] sm:$0xff] (%p33_p5)   ;;  %182 = vst [vmem:[%s162_s7] sm:$0xff] (%p33_p5), %v181_v0   ;;  %186 = vst [vmem:[%s162_s7 + $0x8] sm:$0xff] (%p33_p5), %v185_v1   ;;  %v193_v3 = vld [vmem:[%s165_s6 + $0x28] sm:$0xff] (%p33_p5)  }
  0x18   : > { %190 = vst [vmem:[%s162_s7 + $0x10] sm:$0xff] (%p33_p5), %v189_v2   ;;  %194 = vst [vmem:[%s162_s7 + $0x18] sm:$0xff] (%p33_p5), %v193_v3  }
  0x1a PF: > { %p542_p10 = scmp.ge.s32.totalorder %s683_s18, 1  ;;  %p234_p11 = scmp.lt.s32.totalorder %s683_s18, 3 }
  0x1c   : > { %p235_p12 = pnand %p542_p10, %p234_p11 }
  0x1d   : > { %v611_v4 = vld [vmem:[%s849_s1 + $0x4] ss:$8 sps:$4 sm:$0xff] (!%p235_p12)   ;;  %s241_s10 = sand.u32 (!%p235_p12), 1, %s675_s16   ;;  %v613_v5 = vld [vmem:[%s849_s1] ss:$8 sps:$4 sm:$0xff] (!%p235_p12)   ;;  %v685_v6 = vmov (!%p235_p12), 0   ;;  %v409_v13 = vlaneseq (!%p235_p12) }
  0x1e   : > { %238 = sbr.rel (%p235_p12) target bundleno = 285 (0x11d), region = 73  ;;  %366 = vmatprep.mubr.bf16.mxu0 (!%p235_p12), %v685_v6  ;;  %386 = vmatprep.mubr.bf16.mxu1 (!%p235_p12), %v685_v6  ;;  %s779_s13 = sshll.u32 (!%p235_p12), %s241_s10, 5  ;;  %v614_v7 = vld [vmem:[%s849_s1 + $0x14] ss:$8 sps:$4 sm:$0xff] (!%p235_p12)   ;;  %v616_v8 = vld [vmem:[%s849_s1 + $0x10] ss:$8 sps:$4 sm:$0xff] (!%p235_p12)  }
  0x1f   : > { %334 = vmatprep.subr.bf16.mxu0 (!%p235_p12), %v611_v4  ;;  %565 = vmatprep.subr.bf16.mxu1 (!%p235_p12), %v611_v4  ;;  %s243_s27 = scalar_lea.vmem (!%p235_p12), [#allocation2], %s779_s13  ;;  %vm321_vm0 = vcmask (!%p235_p12), 261120   ;;  %v410_v14 = vshrl.u32 (!%p235_p12), %v409_v13, 7  ;;  %v407_v16 = vld [vmem:[%s850_s2] sm:$0x3] (!%p235_p12)  ;;  %s265_s6 = scalar_lea.vmem (!%p235_p12), [#allocation3], %s779_s13 }
  0x20   : > { %335 = vmatpush1.bf16.msra.mxu0 (!%p235_p12), %v613_v5  ;;  %567 = vmatpush1.bf16.msra.mxu1 (!%p235_p12), %v613_v5  ;;  %v617_v9 = vld [vmem:[%s243_s27] sm:$0xff] (!%p235_p12)   ;;  %v618_v10 = vld [vmem:[%s243_s27 + $0x10] sm:$0xff] (!%p235_p12)   ;;  %v619_v11 = vld [vmem:[%s243_s27 + $0x8] sm:$0xff] (!%p235_p12)   ;;  %s468_s7 = sshll.u32 (!%p235_p12), %s265_s6, 4  ;;  %s564_s8 = sshll.u32 (!%p235_p12), %s535_s19, 9  ;;  %s797_s7 = int_to_ptr.vmem [resolvable:$true] %s468_s7 }
  0x21   : > { %336 = vmatprep.subr.bf16.mxu0 (!%p235_p12), %v614_v7  ;;  %566 = vmatprep.subr.bf16.mxu1 (!%p235_p12), %v614_v7  ;;  %v620_v12 = vld [vmem:[%s243_s27 + $0x18] sm:$0xff] (!%p235_p12)   ;;  %v411_v15 = vsub.s32 (!%p235_p12), 0, %v410_v14  ;;  %v415_v17 = vsub.s32 (!%p235_p12), 1, %v410_v14  ;;  %v557_v34 = vld [vmem:[%s851_s3] ss:$0 sm:$0xff] (!%p235_p12)  ;;  %s802_s12 = scalar_lea.hbm (!%p235_p12), %s852_s4, %s564_s8  ;;  %s806_s13 = scalar_lea.sflag (!%p235_p12), [#allocation4], %s241_s10 }
  0x22   : > { %s621_s14 = scalar_lea.vmem (!%p235_p12), %s797_s7, 512  ;;  %s686_s19 = smov (!%p235_p12), [#allocation3]  }
  0x23   : > { %v412_v18 = vrot.slane (!%p235_p12), %v407_v16, %v411_v15  ;;  %v416_v19 = vrot.slane (!%p235_p12), %v407_v16, %v415_v17  ;;  %p622_p13 = scmp.ne.s32.totalorder (!%p235_p12), %s797_s7, %s621_s14  ;;  %s625_s20 = sshll.u32 (!%p235_p12), %s686_s19, 4  ;;  %s626_s20 = int_to_ptr.vmem [resolvable:$false] %s625_s20 }
  0x24   : > { %337 = vmatpush1.bf16.msra.mxu0 (!%p235_p12), %v616_v8  ;;  %568 = vmatpush1.bf16.msra.mxu1 (!%p235_p12), %v616_v8  ;;  %s627_s22 = scalar_lea.vmem (!%p235_p12), %s626_s20, 1024  ;;  %p628_p2 = scmp.lt.s32.totalorder (!%p235_p12), %s797_s7, %s626_s20 }
  0x25   : > { %p623_p0 = pnand %p622_p13, %p752_p6  ;;  %p629_p3 = scmp.lt.s32.totalorder %s627_s22, %s621_s14 }
  0x27   : > { %553 = vmatmul.mubr.msk.bf16.vlgmr.msra.gmra.mrb[0].mxu0 %vm321_vm0, %v617_v9  ;;  %555 = vmatmul.mubr.msk.bf16.vlgmr.msra.gmra.mrb[0].mxu1 %vm321_vm0, %v618_v10  ;;  %p624_p1 = pneg %p623_p0  ;;  %p630_p4 = por %p629_p3, %p628_p2 }
  0x28   : > { %376 = vmatprep.mubr.bf16.mxu0 %v685_v6  ;;  %396 = vmatprep.mubr.bf16.mxu1 %v685_v6 }
  0x29   : > { %p631_p5 = pnand %p630_p4, %p624_p1 }
  0x2f   : > { %554 = vmatmul.mubr.msk.bf16.gmra.mrb[4].mxu0 %vm321_vm0, %v619_v11  ;;  %556 = vmatmul.mubr.msk.bf16.gmra.mrb[4].mxu1 %vm321_vm0, %v620_v12 }
  0xfa   : > { %v368_v20 = vpop.f32.mrb[0].mxu0  ;;  %v388_v21 = vpop.f32.mrb[0].mxu1 }
  0xfb   : > { %v419_v22 = vmul.f32 %v412_v18, %v368_v20  ;;  %v370_v23 = vpop.f32.mrb[1].mxu0  ;;  %v390_v24 = vpop.f32.mrb[1].mxu1 }
  0xfc   : > { %v420_v25 = vmul.f32 %v416_v19, %v370_v23  ;;  %v372_v26 = vpop.f32.mrb[2].mxu0  ;;  %v392_v27 = vpop.f32.mrb[2].mxu1 }
  0xfd   : > { %v427_v28 = vmul.f32 %v419_v22, %v388_v21  ;;  %v421_v29 = vmul.f32 %v412_v18, %v372_v26  ;;  %v374_v30 = vpop.f32.mrb[3].mxu0  ;;  %v394_v31 = vpop.f32.mrb[3].mxu1 }
  0xfe   : > { %v428_v32 = vmul.f32 %v420_v25, %v390_v24  ;;  %v422_v33 = vmul.f32 %v416_v19, %v374_v30 }
  0xff   : > { %v429_v35 = vmul.f32 %v421_v29, %v392_v27 }
 0x100   : > { %v435_v36 = vadd.f32 %v428_v32, %v427_v28  ;;  %v430_v37 = vmul.f32 %v422_v33, %v394_v31 }
 0x102   : > { %v446_v38 = vadd.f32 %v557_v34, %v435_v36  ;;  %v436_v39 = vadd.f32 %v430_v37, %v429_v35  ;;  %v378_v40 = vpop.f32.mrb[4].mxu0  ;;  %v398_v41 = vpop.f32.mrb[4].mxu1 }
 0x103   : > { %v423_v42 = vmul.f32 %v412_v18, %v378_v40  ;;  %v380_v43 = vpop.f32.mrb[5].mxu0  ;;  %v400_v44 = vpop.f32.mrb[5].mxu1 }
 0x104   : > { %450 = vst [vmem:[%s265_s6] sm:$0xff] %v446_v38  ;;  %v447_v45 = vadd.f32 %v557_v34, %v436_v39  ;;  %v424_v46 = vmul.f32 %v416_v19, %v380_v43  ;;  %v382_v47 = vpop.f32.mrb[6].mxu0  ;;  %v402_v48 = vpop.f32.mrb[6].mxu1 }
 0x105   : > { %v431_v49 = vmul.f32 %v423_v42, %v398_v41  ;;  %v425_v50 = vmul.f32 %v412_v18, %v382_v47  ;;  %v384_v51 = vpop.f32.mrb[7].mxu0  ;;  %v404_v52 = vpop.f32.mrb[7].mxu1 }
 0x106   : > { %451 = vst [vmem:[%s265_s6 + $0x8] sm:$0xff] %v447_v45  ;;  %v432_v53 = vmul.f32 %v424_v46, %v400_v44  ;;  %v426_v54 = vmul.f32 %v416_v19, %v384_v51 }
 0x107   : > { %v433_v55 = vmul.f32 %v425_v50, %v402_v48 }
 0x108   : > { %v437_v56 = vadd.f32 %v432_v53, %v431_v49  ;;  %v434_v57 = vmul.f32 %v426_v54, %v404_v52 }
 0x10a   : > { %v448_v58 = vadd.f32 %v557_v34, %v437_v56  ;;  %v438_v59 = vadd.f32 %v434_v57, %v433_v55 }
 0x10c   : > { %452 = vst [vmem:[%s265_s6 + $0x10] sm:$0xff] %v448_v58  ;;  %v449_v60 = vadd.f32 %v557_v34, %v438_v59 }
 0x10e   : > { %453 = vst [vmem:[%s265_s6 + $0x18] sm:$0xff] %v449_v60 }
 0x10f   : > { %634 = shalt.err (!%p631_p5)
}
 0x110   : > { %s635_s10 = scalar_lea.hbm %s802_s12, 512  ;;  %s639_s28 = scalar_lea.hbm %s852_s4, 1024 }
 0x111   : > { %p636_p7 = scmp.ne.s32.totalorder %s802_s12, %s635_s10  ;;  %p640_p12 = scmp.lt.u32.totalorder %s802_s12, %s852_s4 }
 0x112   : > { %p641_p13 = scmp.lt.u32.totalorder %s639_s28, %s635_s10  ;;  %p643_p1 = scmp.lt.u32.totalorder %s635_s10, %s802_s12 }
 0x113   : > { %p637_p10 = pnand %p636_p7, %p752_p6 }
 0x114   : > { %p642_p0 = por %p641_p13, %p640_p12 }
 0x115   : > { %p638_p11 = pneg %p637_p10 }
 0x116   : > { %p644_p2 = por %p643_p1, %p642_p0 }
 0x118   : > { %p645_p3 = pnand %p644_p2, %p638_p11 }
 0x11a   : > { %648 = shalt.err (!%p645_p3)
}
 0x11b   : > { %s687_s5 = smov 128   ;;  %s688_s6 = smov 8  }
 0x11c   : > { %569 = dma.vmem_to_hbm [thread:$0]  (%p752_p6), %s797_s7, 512, %s802_s12, %s806_s13, %s687_s5, %s687_s5, %s688_s6  }
 0x11d PF: > { %s483_s8 = sand.u32 1, %s671_s15   ;;  %p572_p4 = pnand %p538_p9, %p756_p8 }
 0x11e   : > { %s484_s9 = scalar_lea.sflag [#allocation4], %s483_s8 }
 0x11f   : > { %666 = dma.done.wait (!%p572_p4), %s484_s9, 512  }
 0x120   : > { %668 = vsyncadd (!%p572_p4), %s484_s9, 4294966784  ;;  %p14_p5 = scmp.ge.s32.totalorder %s737_s21, 4   ;;  %s855_s15 = smov %s675_s16 }
 0x121   : > { %s856_s16 = smov %s679_s17  ;;  %s857_s17 = smov %s750_s24 }
 0x122   : > { %s858_s18 = smov %s737_s21  ;;  %16 = sbr.rel (!%p14_p5) target bundleno = 3 (0x3), region = 117 }
 0x129   :  { %489 = vsyncpa [#allocation4], 1 }
 0x12a   :  { %491 = vsyncpa [#allocation4 + $0x1], 1 }

</bundles_post_ra>
